<compile_context>
chip_gen: v7x
topology: tpu7x:2x2x1
jax: 0.10.0
libtpu: 0.0.40
codegen_flags: <defaults>
</compile_context>

<pallas_src>
import functools

import jax
import jax.numpy as jnp
from jax.experimental import pallas as pl
from jax.experimental.pallas import tpu as pltpu

EPS = 1e-5                    # PyTorch BatchNorm2d default
MXU_DTYPE = jnp.bfloat16      # matmul operand dtype (accumulation stays f32)
ACT_DTYPE = jnp.bfloat16      # HBM storage dtype for inter-stage activations
LANE = 128                    # lane width
C_ALIGN = 16                  # bf16 sublane tile: keeps tap blocks unmasked


def _round_up(x, m):
    return (x + m - 1) // m * m


def _compiler_params(vmem_est_bytes):
    kwargs = dict(dimension_semantics=("parallel",))
    est = int(1.25 * vmem_est_bytes)
    # Only raise the scoped-VMEM limit when the footprint actually needs it.
    if est > 16 * 1024 * 1024:
        kwargs["vmem_limit_bytes"] = min(est, 100 * 1024 * 1024)
    return pltpu.CompilerParams(**kwargs)


# ----------------------------------------------------------------------------
# im2col packer: 9 shifted 3x3-tap views of x (C, S) -> rhs_ref (9*C, S) bf16.
# Masks/column index are computed once and reused by all 9 taps.
# ----------------------------------------------------------------------------
def _fill_im2col(rhs_ref, x, img_h, img_w):
    """Row-block t = kh*3+kw of rhs_ref holds x[c, (h+kh-1)*W + (w+kw-1)],
    with zeros wherever the tap falls outside the image ('same' padding)."""
    c, s = x.shape
    flat = jax.lax.broadcasted_iota(jnp.int32, (1, s), 1)
    # Column index of each flattened position, computed in f32 (exact while
    # S < 2^24; avoids integer div/mod which has no native VPU op).
    flat_f = flat.astype(jnp.float32)
    col = flat_f - jnp.floor(flat_f / jnp.float32(img_w)) * jnp.float32(img_w)

    # Hoisted boundary masks (one compare each, shared by all taps).
    h_valid = {-1: flat >= img_w,              # h-1 >= 0
               0: None,
               1: flat < (img_h - 1) * img_w}  # h+1 <= H-1
    w_valid = {-1: col >= 1.0,                 # w-1 >= 0
               0: None,
               1: col <= float(img_w - 2)}     # w+1 <= W-1

    for kh in range(3):
        for kw in range(3):
            dh, dw = kh - 1, kw - 1
            d = dh * img_w + dw                      # flat shift amount
            # shifted[s] = x[s + d]  (circular; wrap-around killed by masks)
            src = x if d == 0 else pltpu.roll(x, (-d) % s, axis=1)

            mh, mw = h_valid[dh], w_valid[dw]
            if mh is None:
                valid = mw
            elif mw is None:
                valid = mh
            else:
                valid = mh & mw

            tap = src if valid is None else jnp.where(valid, src, 0.0)
            t = kh * 3 + kw
            # Pre-cast store: the scratch is bf16.
            rhs_ref[t * c:(t + 1) * c, :] = tap.astype(MXU_DTYPE)


def _masked_stats(y, true_s):
    """Zero padded spatial columns and return (y, sum, sum_sq)."""
    s_pad = y.shape[1]
    if true_s < s_pad:
        flat = jax.lax.broadcasted_iota(jnp.int32, (1, s_pad), 1)
        y = jnp.where(flat < true_s, y, 0.0)
    return (y,
            jnp.sum(y, axis=1, keepdims=True),
            jnp.sum(y * y, axis=1, keepdims=True))


# ----------------------------------------------------------------------------
# Kernel 1: conv3x3 (single MXU dot) + per-image BN partial statistics.
# ----------------------------------------------------------------------------
def _conv_stats_kernel(x_ref, w_ref, y_ref, sum_ref, sq_ref, rhs_ref,
                       *, img_h, img_w, true_s):
    x = x_ref[0]                                             # (Cin, S) f32
    _fill_im2col(rhs_ref, x, img_h, img_w)
    y = jnp.dot(w_ref[...], rhs_ref[...],                    # bf16 x bf16
                preferred_element_type=jnp.float32)          # (Cout, S) f32
    y, ysum, ysq = _masked_stats(y, true_s)
    y_ref[0] = y.astype(y_ref.dtype)                         # bf16 to HBM
    sum_ref[0] = ysum                                        # (Cout, 1) f32
    sq_ref[0] = ysq


def _conv3x3_stats(x2, w2d, img_h, img_w, true_s):
    n, cin, s = x2.shape
    cout, k = w2d.shape
    kern = functools.partial(_conv_stats_kernel,
                             img_h=img_h, img_w=img_w, true_s=true_s)
    est = (2 * cin * s * 4          # x block (f32, double-buffered)
           + 2 * cout * k * 2       # bf16 weight
           + k * s * 2              # bf16 im2col scratch
           + 2 * (cout * s * 2 + 2 * cout * 4))   # outputs, double-buffered
    return pl.pallas_call(
        kern,
        out_shape=(jax.ShapeDtypeStruct((n, cout, s), ACT_DTYPE),
                   jax.ShapeDtypeStruct((n, cout, 1), jnp.float32),
                   jax.ShapeDtypeStruct((n, cout, 1), jnp.float32)),
        grid=(n,),
        in_specs=[pl.BlockSpec((1, cin, s), lambda i: (i, 0, 0)),
                  pl.BlockSpec((cout, k), lambda i: (0, 0))],
        out_specs=(pl.BlockSpec((1, cout, s), lambda i: (i, 0, 0)),
                   pl.BlockSpec((1, cout, 1), lambda i: (i, 0, 0)),
                   pl.BlockSpec((1, cout, 1), lambda i: (i, 0, 0))),
        scratch_shapes=[pltpu.VMEM((k, s), MXU_DTYPE)],
        compiler_params=_compiler_params(est),
    )(x2, w2d)


# ----------------------------------------------------------------------------
# Kernel 2: fused BN(prev)+ReLU -> conv3x3 (single dot) + partial statistics.
# ----------------------------------------------------------------------------
def _bn_relu_conv_stats_kernel(y1_ref, scale_ref, shift_ref, w_ref,
                               y2_ref, sum_ref, sq_ref, rhs_ref,
                               *, img_h, img_w, true_s):
    # BN of conv1 folded to per-channel scale/shift, fused with ReLU, applied
    # in f32 to the bf16 tile loaded from HBM.
    h = jnp.maximum(
        y1_ref[0].astype(jnp.float32) * scale_ref[...] + shift_ref[...], 0.0)
    _fill_im2col(rhs_ref, h, img_h, img_w)
    y = jnp.dot(w_ref[...], rhs_ref[...],
                preferred_element_type=jnp.float32)
    y, ysum, ysq = _masked_stats(y, true_s)
    y2_ref[0] = y.astype(y2_ref.dtype)
    sum_ref[0] = ysum
    sq_ref[0] = ysq


def _bn_relu_conv3x3_stats(y1, scale, shift, w2d, img_h, img_w, true_s):
    n, cin, s = y1.shape
    cout, k = w2d.shape
    kern = functools.partial(_bn_relu_conv_stats_kernel,
                             img_h=img_h, img_w=img_w, true_s=true_s)
    est = (2 * cin * s * 2          # y1 block (bf16, double-buffered)
           + 2 * cout * k * 2
           + k * s * 2
           + 2 * (cout * s * 2 + 2 * cout * 4)
           + 4 * cin * 4)           # scale/shift
    return pl.pallas_call(
        kern,
        out_shape=(jax.ShapeDtypeStruct((n, cout, s), ACT_DTYPE),
                   jax.ShapeDtypeStruct((n, cout, 1), jnp.float32),
                   jax.ShapeDtypeStruct((n, cout, 1), jnp.float32)),
        grid=(n,),
        in_specs=[pl.BlockSpec((1, cin, s), lambda i: (i, 0, 0)),
                  pl.BlockSpec((cin, 1), lambda i: (0, 0)),
                  pl.BlockSpec((cin, 1), lambda i: (0, 0)),
                  pl.BlockSpec((cout, k), lambda i: (0, 0))],
        out_specs=(pl.BlockSpec((1, cout, s), lambda i: (i, 0, 0)),
                   pl.BlockSpec((1, cout, 1), lambda i: (i, 0, 0)),
                   pl.BlockSpec((1, cout, 1), lambda i: (i, 0, 0))),
        scratch_shapes=[pltpu.VMEM((k, s), MXU_DTYPE)],
        compiler_params=_compiler_params(est),
    )(y1, scale, shift, w2d)


# ----------------------------------------------------------------------------
# Kernel 3: final fused BN + ReLU (elementwise, lane-dense).
# TODO(synk): fuse this into the consumer of DoubleConv (next block / pooling)
# to save one HBM round-trip of y2, as BN1+ReLU is fused into kernel 2.
# ----------------------------------------------------------------------------
def _bn_relu_kernel(y_ref, scale_ref, shift_ref, o_ref):
    o_ref[0] = jnp.maximum(
        y_ref[0].astype(jnp.float32) * scale_ref[...] + shift_ref[...],
        0.0).astype(o_ref.dtype)


def _bn_relu(y, scale, shift):
    n, c, s = y.shape
    est = 2 * c * s * 2 + 2 * c * s * 4 + 4 * c * 4
    return pl.pallas_call(
        _bn_relu_kernel,
        out_shape=jax.ShapeDtypeStruct((n, c, s), jnp.float32),
        grid=(n,),
        in_specs=[pl.BlockSpec((1, c, s), lambda i: (i, 0, 0)),
                  pl.BlockSpec((c, 1), lambda i: (0, 0)),
                  pl.BlockSpec((c, 1), lambda i: (0, 0))],
        out_specs=pl.BlockSpec((1, c, s), lambda i: (i, 0, 0)),
        compiler_params=_compiler_params(est),
    )(y, scale, shift)


# ----------------------------------------------------------------------------
# DoubleConv forward (NCHW in / NCHW out, PyTorch-layout weights).
# ----------------------------------------------------------------------------
def _fold_bn(part_sum, part_sq, gamma, beta, count):
    """Fold training-mode BatchNorm (batch stats, biased var) into scale/shift."""
    total = jnp.sum(part_sum[:, :, 0], axis=0)
    total_sq = jnp.sum(part_sq[:, :, 0], axis=0)
    mean = total / count
    # E[x^2]-E[x]^2 can go slightly negative from cancellation; clamp at 0.
    var = jnp.maximum(total_sq / count - mean * mean, 0.0)
    scale = gamma / jnp.sqrt(var + EPS)
    shift = beta - mean * scale
    return scale.reshape(-1, 1), shift.reshape(-1, 1)


def _pack_weight(w_oihw, ci, ci_p, co, co_p):
    """(Cout,Cin,3,3) -> zero-pad channels -> (Cout_p, 9*Cin_p) bf16,
    K ordered (kh, kw, cin) to match the im2col row order."""
    w = jnp.pad(w_oihw.astype(jnp.float32),
                ((0, co_p - co), (0, ci_p - ci), (0, 0), (0, 0)))
    return w.transpose(0, 2, 3, 1).reshape(co_p, 9 * ci_p).astype(MXU_DTYPE)


def _pad_vec(v, total, fill):
    v = v.astype(jnp.float32)
    if total == v.shape[0]:
        return v
    return jnp.pad(v, (0, total - v.shape[0]), constant_values=fill)


def double_conv(x_nchw, params):
    n, cin, h, w = x_nchw.shape
    cout = params["w1"].shape[0]
    s = h * w
    cin_p = _round_up(cin, C_ALIGN)
    cout_p = _round_up(cout, C_ALIGN)
    s_p = _round_up(s, LANE)
    count = float(n * s)          # true element count (padding masked out)

    # NCHW -> (N, C, H*W): pure reshape, then zero-pad channels (sublane-tile
    # aligned tap blocks) and the flattened spatial axis (lane-dense stores).
    x2 = x_nchw.reshape(n, cin, s).astype(jnp.float32)
    x2 = jnp.pad(x2, ((0, 0), (0, cin_p - cin), (0, s_p - s)))

    w1 = _pack_weight(params["w1"], cin, cin_p, cout, cout_p)
    w2 = _pack_weight(params["w2"], cout, cout_p, cout, cout_p)
    gamma1 = _pad_vec(params["gamma1"], cout_p, 1.0)
    beta1 = _pad_vec(params["beta1"], cout_p, 0.0)
    gamma2 = _pad_vec(params["gamma2"], cout_p, 1.0)
    beta2 = _pad_vec(params["beta2"], cout_p, 0.0)

    y1, s1, q1 = _conv3x3_stats(x2, w1, h, w, s)
    scale1, shift1 = _fold_bn(s1, q1, gamma1, beta1, count)

    y2, s2, q2 = _bn_relu_conv3x3_stats(y1, scale1, shift1, w2, h, w, s)
    scale2, shift2 = _fold_bn(s2, q2, gamma2, beta2, count)

    out = _bn_relu(y2, scale2, shift2)
    return out[:, :cout, :s].reshape(n, cout, h, w)


# ----------------------------------------------------------------------------
# Pure-JAX reference (same math via lax.conv) for the correctness check.
# ----------------------------------------------------------------------------
def double_conv_reference(x_nchw, params):
    def conv(x, w):
        return jax.lax.conv_general_dilated(
            x, w, window_strides=(1, 1), padding="SAME",
            dimension_numbers=("NCHW", "OIHW", "NCHW"))

    def block(inp, w, gamma, beta):
        y = conv(inp, w)
        mean = y.mean(axis=(0, 2, 3), keepdims=True)
        var = y.var(axis=(0, 2, 3), keepdims=True)
        yn = (y - mean) / jnp.sqrt(var + EPS)
        return jax.nn.relu(yn * gamma[None, :, None, None]
                           + beta[None, :, None, None])

    h1 = block(x_nchw, params["w1"], params["gamma1"], params["beta1"])
    return block(h1, params["w2"], params["gamma2"], params["beta2"])


if __name__ == "__main__":
    key = jax.random.PRNGKey(0)
    n, in_ch, hh, ww = 2, 4, 16, 16
    out_ch = 8

    k = jax.random.split(key, 7)
    x = jax.random.normal(k[0], (n, in_ch, hh, ww), jnp.float32)

    params = {
        # PyTorch Conv2d weight layout: (Cout, Cin, 3, 3), no bias.
        "w1": jax.random.normal(k[1], (out_ch, in_ch, 3, 3), jnp.float32)
              / jnp.sqrt(float(in_ch * 9)),
        "w2": jax.random.normal(k[2], (out_ch, out_ch, 3, 3), jnp.float32)
              / jnp.sqrt(float(out_ch * 9)),
        "gamma1": 1.0 + 0.1 * jax.random.normal(k[3], (out_ch,), jnp.float32),
        "beta1": 0.1 * jax.random.normal(k[4], (out_ch,), jnp.float32),
        "gamma2": 1.0 + 0.1 * jax.random.normal(k[5], (out_ch,), jnp.float32),
        "beta2": 0.1 * jax.random.normal(k[6], (out_ch,), jnp.float32),
    }

    out = jax.block_until_ready(double_conv(x, params))
    ref = jax.block_until_ready(double_conv_reference(x, params))

    assert out.shape == (n, out_ch, hh, ww), out.shape
    assert bool(jnp.all(jnp.isfinite(out)))
    max_err = float(jnp.max(jnp.abs(out - ref)))
    # bf16 matmul operands + bf16 intermediate storage (f32 accumulation /
    # statistics) vs the all-f32 reference.
    assert max_err < 1e-1, f"max abs error vs reference: {max_err}"

    print("KERNEL_OK")
</pallas_src>

<mosaic_0001>
module attributes {stable_mosaic.version = 11 : i64} {
  func.func @_conv_stats_kernel(%arg0: i32, %arg1: memref<1x16x256xf32, #tpu.memory_space<vmem>>, %arg2: memref<16x144xbf16, #tpu.memory_space<vmem>>, %arg3: memref<1x16x256xbf16, #tpu.memory_space<vmem>>, %arg4: memref<1x16x1xf32, #tpu.memory_space<vmem>>, %arg5: memref<1x16x1xf32, #tpu.memory_space<vmem>>, %arg6: memref<144x256xbf16, #tpu.memory_space<vmem>>) attributes {dimension_semantics = [#tpu.dimension_semantics<parallel>], iteration_bounds = array<i64: 2>, scalar_prefetch = 0 : i64, scratch_operands = 1 : i64, tpu.core_type = #tpu.core_type<tc>, window_params = [{transform_indices = @transform_0, window_bounds = array<i64: 1, 16, 256>}, {pipeline_mode = #tpu.pipeline_mode<synchronous>, transform_indices = @transform_1, window_bounds = array<i64: 16, 144>}, {transform_indices = @transform_2, window_bounds = array<i64: 1, 16, 256>}, {transform_indices = @transform_3, window_bounds = array<i64: 1, 16, 1>}, {transform_indices = @transform_4, window_bounds = array<i64: 1, 16, 1>}]} {
    %c0 = arith.constant 0 : index
    %c0_0 = arith.constant 0 : index
    %c0_1 = arith.constant 0 : index
    %0 = vector.load %arg1[%c0, %c0_0, %c0_1] : memref<1x16x256xf32, #tpu.memory_space<vmem>>, vector<1x16x256xf32>
    %1 = vector.shape_cast %0 : vector<1x16x256xf32> to vector<16x256xf32>
    %2 = tpu.iota {dimensions = array<i32: 1>} : vector<1x256xi32>
    %3 = arith.sitofp %2 : vector<1x256xi32> to vector<1x256xf32>
    %cst = arith.constant 1.600000e+01 : f32
    %4 = vector.broadcast %cst : f32 to vector<1x256xf32>
    %5 = arith.divf %3, %4 : vector<1x256xf32>
    %6 = math.floor %5 : vector<1x256xf32>
    %cst_2 = arith.constant 1.600000e+01 : f32
    %7 = vector.broadcast %cst_2 : f32 to vector<1x256xf32>
    %8 = arith.mulf %6, %7 : vector<1x256xf32>
    %9 = arith.subf %3, %8 : vector<1x256xf32>
    %c16_i32 = arith.constant 16 : i32
    %10 = vector.broadcast %c16_i32 : i32 to vector<1x256xi32>
    %11 = arith.cmpi sge, %2, %10 : vector<1x256xi32>
    %c240_i32 = arith.constant 240 : i32
    %12 = vector.broadcast %c240_i32 : i32 to vector<1x256xi32>
    %13 = arith.cmpi slt, %2, %12 : vector<1x256xi32>
    %cst_3 = arith.constant 1.000000e+00 : f32
    %14 = vector.broadcast %cst_3 : f32 to vector<1x256xf32>
    %15 = arith.cmpf oge, %9, %14 : vector<1x256xf32>
    %cst_4 = arith.constant 1.400000e+01 : f32
    %16 = vector.broadcast %cst_4 : f32 to vector<1x256xf32>
    %17 = arith.cmpf ole, %9, %16 : vector<1x256xf32>
    %c17_i32 = arith.constant 17 : i32
    %18 = tpu.dynamic_rotate %1 by %c17_i32 dim 1 : vector<16x256xf32>, i32 -> vector<16x256xf32>
    %19 = arith.andi %11, %15 : vector<1x256xi1>
    %cst_5 = arith.constant 0.000000e+00 : f32
    %20 = vector.shape_cast %19 : vector<1x256xi1> to vector<1x256xi1>
    %21 = vector.broadcast %20 : vector<1x256xi1> to vector<16x256xi1>
    %22 = vector.broadcast %cst_5 : f32 to vector<16x256xf32>
    %23 = arith.select %21, %18, %22 : vector<16x256xi1>, vector<16x256xf32>
    %24 = arith.truncf %23 : vector<16x256xf32> to vector<16x256xbf16>
    %c0_6 = arith.constant 0 : index
    %c0_7 = arith.constant 0 : index
    %25 = vector.load %arg6[%c0_6, %c0_7] : memref<144x256xbf16, #tpu.memory_space<vmem>>, vector<16x256xbf16>
    tpu.vector_store %arg6[%c0_6, %c0_7], %24 {strides = array<i32>} : memref<144x256xbf16, #tpu.memory_space<vmem>>, vector<16x256xbf16>,
    %c16_i32_8 = arith.constant 16 : i32
    %26 = tpu.dynamic_rotate %1 by %c16_i32_8 dim 1 : vector<16x256xf32>, i32 -> vector<16x256xf32>
    %cst_9 = arith.constant 0.000000e+00 : f32
    %27 = vector.shape_cast %11 : vector<1x256xi1> to vector<1x256xi1>
    %28 = vector.broadcast %27 : vector<1x256xi1> to vector<16x256xi1>
    %29 = vector.broadcast %cst_9 : f32 to vector<16x256xf32>
    %30 = arith.select %28, %26, %29 : vector<16x256xi1>, vector<16x256xf32>
    %31 = arith.truncf %30 : vector<16x256xf32> to vector<16x256xbf16>
    %c16 = arith.constant 16 : index
    %c0_10 = arith.constant 0 : index
    %32 = vector.load %arg6[%c16, %c0_10] : memref<144x256xbf16, #tpu.memory_space<vmem>>, vector<16x256xbf16>
    tpu.vector_store %arg6[%c16, %c0_10], %31 {strides = array<i32>} : memref<144x256xbf16, #tpu.memory_space<vmem>>, vector<16x256xbf16>,
    %c15_i32 = arith.constant 15 : i32
    %33 = tpu.dynamic_rotate %1 by %c15_i32 dim 1 : vector<16x256xf32>, i32 -> vector<16x256xf32>
    %34 = arith.andi %11, %17 : vector<1x256xi1>
    %cst_11 = arith.constant 0.000000e+00 : f32
    %35 = vector.shape_cast %34 : vector<1x256xi1> to vector<1x256xi1>
    %36 = vector.broadcast %35 : vector<1x256xi1> to vector<16x256xi1>
    %37 = vector.broadcast %cst_11 : f32 to vector<16x256xf32>
    %38 = arith.select %36, %33, %37 : vector<16x256xi1>, vector<16x256xf32>
    %39 = arith.truncf %38 : vector<16x256xf32> to vector<16x256xbf16>
    %c32 = arith.constant 32 : index
    %c0_12 = arith.constant 0 : index
    %40 = vector.load %arg6[%c32, %c0_12] : memref<144x256xbf16, #tpu.memory_space<vmem>>, vector<16x256xbf16>
    tpu.vector_store %arg6[%c32, %c0_12], %39 {strides = array<i32>} : memref<144x256xbf16, #tpu.memory_space<vmem>>, vector<16x256xbf16>,
    %c1_i32 = arith.constant 1 : i32
    %41 = tpu.dynamic_rotate %1 by %c1_i32 dim 1 : vector<16x256xf32>, i32 -> vector<16x256xf32>
    %cst_13 = arith.constant 0.000000e+00 : f32
    %42 = vector.shape_cast %15 : vector<1x256xi1> to vector<1x256xi1>
    %43 = vector.broadcast %42 : vector<1x256xi1> to vector<16x256xi1>
    %44 = vector.broadcast %cst_13 : f32 to vector<16x256xf32>
    %45 = arith.select %43, %41, %44 : vector<16x256xi1>, vector<16x256xf32>
    %46 = arith.truncf %45 : vector<16x256xf32> to vector<16x256xbf16>
    %c48 = arith.constant 48 : index
    %c0_14 = arith.constant 0 : index
    %47 = vector.load %arg6[%c48, %c0_14] : memref<144x256xbf16, #tpu.memory_space<vmem>>, vector<16x256xbf16>
    tpu.vector_store %arg6[%c48, %c0_14], %46 {strides = array<i32>} : memref<144x256xbf16, #tpu.memory_space<vmem>>, vector<16x256xbf16>,
    %48 = arith.truncf %1 : vector<16x256xf32> to vector<16x256xbf16>
    %c64 = arith.constant 64 : index
    %c0_15 = arith.constant 0 : index
    %49 = vector.load %arg6[%c64, %c0_15] : memref<144x256xbf16, #tpu.memory_space<vmem>>, vector<16x256xbf16>
    tpu.vector_store %arg6[%c64, %c0_15], %48 {strides = array<i32>} : memref<144x256xbf16, #tpu.memory_space<vmem>>, vector<16x256xbf16>,
    %c255_i32 = arith.constant 255 : i32
    %50 = tpu.dynamic_rotate %1 by %c255_i32 dim 1 : vector<16x256xf32>, i32 -> vector<16x256xf32>
    %cst_16 = arith.constant 0.000000e+00 : f32
    %51 = vector.shape_cast %17 : vector<1x256xi1> to vector<1x256xi1>
    %52 = vector.broadcast %51 : vector<1x256xi1> to vector<16x256xi1>
    %53 = vector.broadcast %cst_16 : f32 to vector<16x256xf32>
    %54 = arith.select %52, %50, %53 : vector<16x256xi1>, vector<16x256xf32>
    %55 = arith.truncf %54 : vector<16x256xf32> to vector<16x256xbf16>
    %c80 = arith.constant 80 : index
    %c0_17 = arith.constant 0 : index
    %56 = vector.load %arg6[%c80, %c0_17] : memref<144x256xbf16, #tpu.memory_space<vmem>>, vector<16x256xbf16>
    tpu.vector_store %arg6[%c80, %c0_17], %55 {strides = array<i32>} : memref<144x256xbf16, #tpu.memory_space<vmem>>, vector<16x256xbf16>,
    %c241_i32 = arith.constant 241 : i32
    %57 = tpu.dynamic_rotate %1 by %c241_i32 dim 1 : vector<16x256xf32>, i32 -> vector<16x256xf32>
    %58 = arith.andi %13, %15 : vector<1x256xi1>
    %cst_18 = arith.constant 0.000000e+00 : f32
    %59 = vector.shape_cast %58 : vector<1x256xi1> to vector<1x256xi1>
    %60 = vector.broadcast %59 : vector<1x256xi1> to vector<16x256xi1>
    %61 = vector.broadcast %cst_18 : f32 to vector<16x256xf32>
    %62 = arith.select %60, %57, %61 : vector<16x256xi1>, vector<16x256xf32>
    %63 = arith.truncf %62 : vector<16x256xf32> to vector<16x256xbf16>
    %c96 = arith.constant 96 : index
    %c0_19 = arith.constant 0 : index
    %64 = vector.load %arg6[%c96, %c0_19] : memref<144x256xbf16, #tpu.memory_space<vmem>>, vector<16x256xbf16>
    tpu.vector_store %arg6[%c96, %c0_19], %63 {strides = array<i32>} : memref<144x256xbf16, #tpu.memory_space<vmem>>, vector<16x256xbf16>,
    %c240_i32_20 = arith.constant 240 : i32
    %65 = tpu.dynamic_rotate %1 by %c240_i32_20 dim 1 : vector<16x256xf32>, i32 -> vector<16x256xf32>
    %cst_21 = arith.constant 0.000000e+00 : f32
    %66 = vector.shape_cast %13 : vector<1x256xi1> to vector<1x256xi1>
    %67 = vector.broadcast %66 : vector<1x256xi1> to vector<16x256xi1>
    %68 = vector.broadcast %cst_21 : f32 to vector<16x256xf32>
    %69 = arith.select %67, %65, %68 : vector<16x256xi1>, vector<16x256xf32>
    %70 = arith.truncf %69 : vector<16x256xf32> to vector<16x256xbf16>
    %c112 = arith.constant 112 : index
    %c0_22 = arith.constant 0 : index
    %71 = vector.load %arg6[%c112, %c0_22] : memref<144x256xbf16, #tpu.memory_space<vmem>>, vector<16x256xbf16>
    tpu.vector_store %arg6[%c112, %c0_22], %70 {strides = array<i32>} : memref<144x256xbf16, #tpu.memory_space<vmem>>, vector<16x256xbf16>,
    %c239_i32 = arith.constant 239 : i32
    %72 = tpu.dynamic_rotate %1 by %c239_i32 dim 1 : vector<16x256xf32>, i32 -> vector<16x256xf32>
    %73 = arith.andi %13, %17 : vector<1x256xi1>
    %cst_23 = arith.constant 0.000000e+00 : f32
    %74 = vector.shape_cast %73 : vector<1x256xi1> to vector<1x256xi1>
    %75 = vector.broadcast %74 : vector<1x256xi1> to vector<16x256xi1>
    %76 = vector.broadcast %cst_23 : f32 to vector<16x256xf32>
    %77 = arith.select %75, %72, %76 : vector<16x256xi1>, vector<16x256xf32>
    %78 = arith.truncf %77 : vector<16x256xf32> to vector<16x256xbf16>
    %c128 = arith.constant 128 : index
    %c0_24 = arith.constant 0 : index
    %79 = vector.load %arg6[%c128, %c0_24] : memref<144x256xbf16, #tpu.memory_space<vmem>>, vector<16x256xbf16>
    tpu.vector_store %arg6[%c128, %c0_24], %78 {strides = array<i32>} : memref<144x256xbf16, #tpu.memory_space<vmem>>, vector<16x256xbf16>,
    %c0_25 = arith.constant 0 : index
    %c0_26 = arith.constant 0 : index
    %80 = vector.load %arg2[%c0_25, %c0_26] : memref<16x144xbf16, #tpu.memory_space<vmem>>, vector<16x144xbf16>
    %c0_27 = arith.constant 0 : index
    %c0_28 = arith.constant 0 : index
    %81 = vector.load %arg6[%c0_27, %c0_28] : memref<144x256xbf16, #tpu.memory_space<vmem>>, vector<144x256xbf16>
    %cst_29 = arith.constant dense<0.000000e+00> : vector<16x256xf32>
    %82 = tpu.matmul %80, %81, %cst_29 {dimension_numbers = #tpu.dot_dimension_numbers<[1], [0], [0], [1], [0, 0, 1, 1], [], []>} : vector<16x144xbf16>, vector<144x256xbf16>, vector<16x256xf32> -> vector<16x256xf32>
    %cst_30 = arith.constant dense<0.000000e+00> : vector<16xf32>
    %83 = vector.multi_reduction <add>, %82, %cst_30 [1] : vector<16x256xf32> to vector<16xf32>
    %84 = vector.shape_cast %83 : vector<16xf32> to vector<16x1xf32>
    %85 = arith.mulf %82, %82 : vector<16x256xf32>
    %cst_31 = arith.constant dense<0.000000e+00> : vector<16xf32>
    %86 = vector.multi_reduction <add>, %85, %cst_31 [1] : vector<16x256xf32> to vector<16xf32>
    %87 = vector.shape_cast %86 : vector<16xf32> to vector<16x1xf32>
    %88 = arith.truncf %82 : vector<16x256xf32> to vector<16x256xbf16>
    %c0_32 = arith.constant 0 : index
    %c0_33 = arith.constant 0 : index
    %c0_34 = arith.constant 0 : index
    %89 = vector.load %arg3[%c0_32, %c0_33, %c0_34] : memref<1x16x256xbf16, #tpu.memory_space<vmem>>, vector<1x16x256xbf16>
    %90 = vector.shape_cast %89 : vector<1x16x256xbf16> to vector<16x256xbf16>
    %91 = vector.shape_cast %88 : vector<16x256xbf16> to vector<1x16x256xbf16>
    tpu.vector_store %arg3[%c0_32, %c0_33, %c0_34], %91 {strides = array<i32>} : memref<1x16x256xbf16, #tpu.memory_space<vmem>>, vector<1x16x256xbf16>,
    %c0_35 = arith.constant 0 : index
    %c0_36 = arith.constant 0 : index
    %c0_37 = arith.constant 0 : index
    %92 = vector.load %arg4[%c0_35, %c0_36, %c0_37] : memref<1x16x1xf32, #tpu.memory_space<vmem>>, vector<1x16x1xf32>
    %93 = vector.shape_cast %92 : vector<1x16x1xf32> to vector<16x1xf32>
    %94 = vector.shape_cast %84 : vector<16x1xf32> to vector<1x16x1xf32>
    tpu.vector_store %arg4[%c0_35, %c0_36, %c0_37], %94 {strides = array<i32>} : memref<1x16x1xf32, #tpu.memory_space<vmem>>, vector<1x16x1xf32>,
    %c0_38 = arith.constant 0 : index
    %c0_39 = arith.constant 0 : index
    %c0_40 = arith.constant 0 : index
    %95 = vector.load %arg5[%c0_38, %c0_39, %c0_40] : memref<1x16x1xf32, #tpu.memory_space<vmem>>, vector<1x16x1xf32>
    %96 = vector.shape_cast %95 : vector<1x16x1xf32> to vector<16x1xf32>
    %97 = vector.shape_cast %87 : vector<16x1xf32> to vector<1x16x1xf32>
    tpu.vector_store %arg5[%c0_38, %c0_39, %c0_40], %97 {strides = array<i32>} : memref<1x16x1xf32, #tpu.memory_space<vmem>>, vector<1x16x1xf32>,
    return
  }
  func.func @transform_0(%arg0: i32) -> (i32, i32, i32) {
    %c0_i32 = arith.constant 0 : i32
    %c0_i32_0 = arith.constant 0 : i32
    %c0_i32_1 = arith.constant 0 : i32
    return %arg0, %c0_i32, %c0_i32_0 : i32, i32, i32
  }
  func.func @transform_1(%arg0: i32) -> (i32, i32) {
    %c0_i32 = arith.constant 0 : i32
    %c0_i32_0 = arith.constant 0 : i32
    %c0_i32_1 = arith.constant 0 : i32
    return %c0_i32, %c0_i32_0 : i32, i32
  }
  func.func @transform_2(%arg0: i32) -> (i32, i32, i32) {
    %c0_i32 = arith.constant 0 : i32
    %c0_i32_0 = arith.constant 0 : i32
    %c0_i32_1 = arith.constant 0 : i32
    return %arg0, %c0_i32, %c0_i32_0 : i32, i32, i32
  }
  func.func @transform_3(%arg0: i32) -> (i32, i32, i32) {
    %c0_i32 = arith.constant 0 : i32
    %c0_i32_0 = arith.constant 0 : i32
    %c0_i32_1 = arith.constant 0 : i32
    return %arg0, %c0_i32, %c0_i32_0 : i32, i32, i32
  }
  func.func @transform_4(%arg0: i32) -> (i32, i32, i32) {
    %c0_i32 = arith.constant 0 : i32
    %c0_i32_0 = arith.constant 0 : i32
    %c0_i32_1 = arith.constant 0 : i32
    return %arg0, %c0_i32, %c0_i32_0 : i32, i32, i32
  }
}

</mosaic_0001>

<bundles_post_ra>
// kernel: tpu_custom_call.1
= control target key start
LH: loop header
LB: loop body
LE: loop exit
PB: predicated region body
PF: predicated region fallthrough
CT: control target
= control target key end

     0   :  { %10 = vsyncpa [#allocation4], 0  ;;  %s1574_s0 = inlined_call_operand.hbm [shape: f32[2,16,256], index: 0, kind: input, shape index: {}]   ;;  %s1575_s1 = inlined_call_operand.hbm [shape: bf16[16,144], index: 1, kind: input, shape index: {}]   ;;  %s1576_s2 = inlined_call_operand.hbm [shape: bf16[2,16,256], index: 2, kind: output, shape index: {0}]   ;;  %s1577_s3 = inlined_call_operand.vmem [shape: f32[2,16,1], index: 3, kind: output, shape index: {1}]   ;;  %s1578_s4 = inlined_call_operand.vmem [shape: f32[2,16,1], index: 4, kind: output, shape index: {2}]  }
   0x1   :  { %12 = vsyncpa [#allocation4 + $0x1], 0 }
   0x2   :  { %13 = vsyncpa [#allocation7], 0 }
   0x3   :  { %14 = vsyncpa [#allocation5], 0 }
   0x4   :  { %16 = vsyncpa [#allocation5 + $0x1], 0  ;;  %s1168_s15 = smov 0   ;;  %s1170_s16 = smov 0  }
   0x5   :  { %s1172_s17 = smov 0   ;;  %s1174_s18 = smov 0  }
   0x6 LB: > { %s1189_s19 = sadd.s32 4294967295, %s1124_s18   ;;  %s769_s20 = sadd.s32 4294967294, %s1124_s18   ;;  %s1124_s18 = sphi %s1174_s18, %s1614_s18   ;;  %s1120_s17 = sphi %s1172_s17, %s1613_s17   ;;  %s1116_s16 = sphi %s1170_s16, %s1612_s16   ;;  %s1112_s15 = sphi %s1168_s15, %s1611_s15  }
   0x7   : > { %p42_p0 = scmp.ne.s32.totalorder %s1116_s16, %s1112_s15  ;;  %p1579_p1 = scmp.eq.s32.totalorder %s1189_s19, 0 }
   0x8   : > { %p93_p3 = scmp.eq.s32.totalorder %s769_s20, 1  ;;  %p770_p5 = scmp.ge.s32.totalorder %s1124_s18, 1 }
   0x9   : > { %p1198_p4 = por %p1579_p1, %p42_p0  ;;  %p152_p7 = scmp.lt.s32.totalorder %s1124_s18, 3 }
   0xa   : > { %p1203_p6 = por %p93_p3, %p42_p0  ;;  %s1126_s24 = smov [#allocation6]  }
   0xb   : > { %s1582_s21 = scalar_select %p1198_p4, 1, 0 }
   0xc   : > { %s1583_s22 = scalar_select %p1203_p6, 1, 0 }
   0xd   : > { %p1208_p8 = pnand %p770_p5, %p152_p7  ;;  %s164_s25 = sshll.u32 %s1126_s24, 4  ;;  %s1212_s25 = int_to_ptr.vmem [resolvable:$true] %s164_s25 }
   0xe   : > { %s1224_s27 = sadd.s32 1, %s1124_s18   ;;  %s29_s28 = sadd.s32 1, %s1120_s17 }
   0xf   : > { %s1584_s23 = scalar_select %p1208_p8, 1, 0 }
  0x10   : > { %p850_p9 = pneg %p1208_p8  ;;  %s26_s29 = ssub.s32 %s1124_s18, %s1224_s27 }
  0x11   : > { %s996_s6 = scalar_lea.hbm %s1575_s1, 256 }
  0x12   : > { %p1219_p11 = pnand %p850_p9, %p1579_p1  ;;  %p997_p12 = scmp.ne.s32.totalorder %s1575_s1, %s996_s6 }
  0x13   : > { %p1003_p5 = scmp.lt.u32.totalorder %s996_s6, %s1575_s1 }
  0x14   : > { %p998_p13 = pneg %p1219_p11 }
  0x16   : > { %p999_p0 = pnand %p998_p13, %p997_p12 }
  0x18   : > { %p1000_p3 = pneg %p999_p0 }
  0x1a   : > { %p1005_p7 = pnand %p1003_p5, %p1000_p3 }
  0x1c   : > { %1008 = shalt.err (!%p1005_p7)
}
  0x1d   : > { %s1009_s11 = scalar_lea.vmem %s1212_s25, 256  ;;  %p1017_p2 = scmp.lt.s32.totalorder %s1212_s25, %s1212_s25 }
  0x1e   : > { %p1010_p9 = scmp.ne.s32.totalorder %s1212_s25, %s1009_s11  ;;  %p1018_p6 = scmp.lt.s32.totalorder %s1009_s11, %s1009_s11 }
  0x20   : > { %p1012_p10 = pnand %p1010_p9, %p998_p13  ;;  %p1019_p4 = por %p1018_p6, %p1017_p2 }
  0x22   : > { %p1013_p1 = pneg %p1012_p10 }
  0x24   : > { %p1020_p8 = pnand %p1019_p4, %p1013_p1 }
  0x26   : > { %1023 = shalt.err (!%p1020_p8)
}
  0x27   : > { %s1127_s12 = smov 128   ;;  %s1128_s13 = smov 8  }
  0x28   : > { %853 = dma.hbm_to_vmem [thread:$0]  (!%p1219_p11), %s1575_s1, 256, %s1212_s25, [#allocation7], %s1127_s12, %s1127_s12, %s1128_s13  }
  0x29   : > { %p27_p2 = scmp.eq.s32.totalorder %s26_s29, 0  ;;  %p36_p1 = scmp.ne.s32.totalorder %s1120_s17, %s1116_s16 }
  0x2a   : > { %p37_p4 = scmp.eq.s32.totalorder %s1124_s18, 0  ;;  %p863_p6 = scmp.lt.s32.totalorder %s1124_s18, 2 }
  0x2b   : > { %s1255_s24 = scalar_select %p27_p2, %s1120_s17, %s29_s28  }
  0x2c   : > { %p38_p8 = por %p37_p4, %p36_p1  ;;  %p1586_p10 = scmp.eq.s32.totalorder %s1189_s19, 1 }
  0x2d   : > { %s178_s5 = sand.u32 1, %s1120_s17   ;;  %s794_s6 = sshll.u32 %s1124_s18, 9 }
  0x2e   : > { %p1259_p12 = por %p1586_p10, %p36_p1  ;;  %s773_s7 = sshll.u32 %s178_s5, 5 }
  0x2f   : > { %s1268_s9 = scalar_lea.hbm %s1574_s0, %s794_s6  ;;  %s182_s25 = scalar_lea.vmem [#allocation3], %s773_s7 }
  0x30   : > { %s189_s28 = sshll.u32 %s182_s25, 4  ;;  %p1270_p11 = pnand %p863_p6, %p38_p8  ;;  %s1274_s28 = int_to_ptr.vmem [resolvable:$true] %s189_s28 }
  0x31   : > { %s1276_s10 = scalar_lea.sflag [#allocation4], %s178_s5  ;;  %s1024_s11 = scalar_lea.hbm %s1268_s9, 512 }
  0x32   : > { %p1025_p13 = scmp.ne.s32.totalorder %s1268_s9, %s1024_s11  ;;  %p1026_p0 = pneg %p1270_p11 }
  0x33   : > { %s1029_s14 = scalar_lea.hbm %s1574_s0, 1024  ;;  %p1030_p7 = scmp.lt.u32.totalorder %s1268_s9, %s1574_s0 }
  0x34   : > { %p1027_p3 = pnand %p1026_p0, %p1025_p13  ;;  %p1031_p9 = scmp.lt.u32.totalorder %s1029_s14, %s1024_s11 }
  0x35   : > { %p1033_p1 = scmp.lt.u32.totalorder %s1024_s11, %s1268_s9 }
  0x36   : > { %p1028_p5 = pneg %p1027_p3  ;;  %p1032_p2 = por %p1031_p9, %p1030_p7 }
  0x38   : > { %p1034_p4 = por %p1033_p1, %p1032_p2 }
  0x3a   : > { %p1035_p6 = pnand %p1034_p4, %p1028_p5 }
  0x3c   : > { %1038 = shalt.err (!%p1035_p6)
}
  0x3d   : > { %s1039_s5 = scalar_lea.vmem %s1274_s28, 512  ;;  %s1129_s7 = smov [#allocation3]  }
  0x3e   : > { %p1040_p8 = scmp.ne.s32.totalorder %s1274_s28, %s1039_s5  ;;  %s1044_s26 = sshll.u32 %s1129_s7, 4  ;;  %s1045_s26 = int_to_ptr.vmem [resolvable:$false] %s1044_s26 }
  0x3f   : > { %s1046_s8 = scalar_lea.vmem %s1045_s26, 1024  ;;  %p1047_p3 = scmp.lt.s32.totalorder %s1274_s28, %s1045_s26 }
  0x40   : > { %p1042_p10 = pnand %p1040_p8, %p1026_p0  ;;  %p1048_p7 = scmp.lt.s32.totalorder %s1046_s8, %s1039_s5 }
  0x42   : > { %p1043_p13 = pneg %p1042_p10  ;;  %p1049_p9 = por %p1048_p7, %p1047_p3 }
  0x44   : > { %p1050_p2 = pnand %p1049_p9, %p1043_p13 }
  0x46   : > { %1053 = shalt.err (!%p1050_p2)
}
  0x47   : > { %s1130_s25 = smov 256   ;;  %s1131_s11 = smov 16  }
  0x48   : > { %857 = dma.hbm_to_vmem [thread:$0]  (!%p1270_p11), %s1268_s9, 512, %s1274_s28, %s1276_s10, %s1130_s25, %s1130_s25, %s1131_s11  }
  0x49   : > { %p1589_p0 = scmp.ne.s32.totalorder %s1584_s23, 0 }
  0x4a   : > { %s1307_s12 = sand.u32 (!%p1589_p0), 1, %s1116_s16   ;;  %p1590_p5 = scmp.ne.s32.totalorder (!%p1589_p0), %s1582_s21, 0 }
  0x4b   : > { %201 = sbr.rel (%p1589_p0) target bundleno = 615 (0x267), region = 28  ;;  %s777_s13 = sshll.u32 (!%p1589_p0), %s1307_s12, 5 }
  0x4c   : > { %s204_s14 = scalar_lea.sflag (!%p1589_p0), [#allocation4], %s1307_s12  ;;  %s207_s20 = scalar_lea.vmem (!%p1589_p0), [#allocation3], %s777_s13 }
  0x52   : > { %1099 = dma.done.wait (%p1590_p5), %s204_s14, 512  }
  0x53   : > { %1101 = vsyncadd (%p1590_p5), %s204_s14, 4294966784  ;;  %p1591_p1 = scmp.eq.s32.totalorder %s1189_s19, 0 }
  0x55   : > { %1103 = dma.done.wait (%p1591_p1), [#allocation7], 256   ;;  %p1592_p11 = pmov %p1591_p1 }
  0x56   : > { %v1319_v0 = vld [vmem:[%s207_s20] sm:$0xff]  ;;  %v1321_v1 = vld [vmem:[%s207_s20 + $0x10] sm:$0xff]  ;;  %v1323_v2 = vld [vmem:[%s207_s20 + $0x8] sm:$0xff]  ;;  %s1132_s23 = smov 16   ;;  %s1133_s21 = smov 17   ;;  %vm524_vm0 = vcmask 130048   ;;  %v261_v9 = vlaneseq }
  0x57   : > { %1105 = vsyncadd (%p1592_p11), [#allocation7], 4294967040  ;;  %v923_v3 = vpack.i.bf16 %v1321_v1, %v1319_v0  ;;  %v1327_v4 = vld [vmem:[%s207_s20 + $0x18] sm:$0xff]  ;;  %s1134_s9 = smov 15   ;;  %v387_v7 = vpack.c.bf16 %v1321_v1, %v1319_v0  ;;  %s1135_s28 = smov 1  }
  0x58   : > { %v928_v5 = vpack.i.bf16 %v1327_v4, %v1323_v2  ;;  %v388_v6 = vpack.c.bf16 %v1327_v4, %v1323_v2  ;;  %s1136_s29 = smov 127   ;;  %s1137_s10 = smov 113   ;;  %v995_v8 = vld [vmem:[#allocation6 + $0x4] ss:$8 sps:$4 sm:$0xff]   ;;  %v1335_v10 = vand.u32 127, %v261_v9 }
  0x59   : > { %924 = vrot.lane.b32.xlu1 %v923_v3, %s1132_s23  ;;  %914 = vrot.lane.b32.xlu0 %v923_v3, %s1133_s21  ;;  %s1138_s6 = smov 112   ;;  %s1139_s5 = smov 111  }
  0x5a   : > { %786 = vmatprep.mubr.msk.bf16.mxu0 %vm524_vm0, %v995_v8  ;;  %v1338_v11 = vadd.s32 128, %v1335_v10  ;;  %v264_v12 = vcvt.s32.f32 %v1335_v10  ;;  %vm275_vm1 = vcmp.ge.s32.totalorder %v1335_v10, 16  ;;  %vm318_vm3 = vcmp.lt.s32.totalorder %v1335_v10, 16  ;;  %s779_s7 = sshll.u32 %s1307_s12, 4  ;;  %s799_s25 = sshll.u32 %s1189_s19, 8 }
  0x5b   : > { %vm291_vm5 = vcmp.lt.s32.totalorder %v1335_v10, 17  ;;  %vm343_vm7 = vcmp.lt.s32.totalorder %v1335_v10, 15  ;;  %vm1395_vm12 = vmpackc.low %vm275_vm1, %vm275_vm1  ;;  %vm370_vm13 = vcmp.lt.s32.totalorder %v1335_v10, 1  ;;  %s231_s26 = scalar_lea.vmem [#allocation8], %s779_s7  ;;  %s1522_s14 = scalar_lea.hbm %s1576_s2, %s799_s25 }
  0x5c   : > { %v265_v13 = vcvt.s32.f32 %v1338_v11  ;;  %v267_v14 = vmul.f32 0.0625, %v264_v12  ;;  %s630_s8 = sshll.u32 %s231_s26, 4  ;;  %s607_s20 = scalar_lea.sflag [#allocation5], %s1307_s12  ;;  %s1516_s8 = int_to_ptr.vmem [resolvable:$true] %s630_s8 }
  0x5d   : > { %929 = vrot.lane.b32.xlu1 %v928_v5, %s1132_s23  ;;  %919 = vrot.lane.b32.xlu0 %v928_v5, %s1133_s21  ;;  %s1054_s23 = scalar_lea.vmem %s1516_s8, 256  ;;  %s1140_s21 = smov [#allocation8]  }
  0x5e   : > { %v268_v15 = vmul.f32 0.0625, %v265_v13  ;;  %v269_v16 = vfloor.f32 %v267_v14  ;;  %p1055_p4 = scmp.ne.s32.totalorder %s1516_s8, %s1054_s23 }
  0x60   : > { %v270_v17 = vfloor.f32 %v268_v15  ;;  %v271_v18 = vmul.f32 16.0, %v269_v16  ;;  %p1056_p6 = pnand %p1055_p4, %p1259_p12 }
  0x61   : > { %939 = vrot.lane.b32.xlu1 %v928_v5, %s1134_s9  ;;  %934 = vrot.lane.b32.xlu0 %v923_v3, %s1134_s9  ;;  %s1058_s9 = sshll.u32 %s1140_s21, 4  ;;  %s1059_s9 = int_to_ptr.vmem [resolvable:$false] %s1058_s9 }
  0x62   : > { %v272_v19 = vmul.f32 16.0, %v270_v17  ;;  %v1342_v20 = vsub.f32 %v264_v12, %v271_v18  ;;  %p1057_p8 = pneg %p1056_p6  ;;  %p1061_p10 = scmp.lt.s32.totalorder %s1516_s8, %s1059_s9 }
  0x64   : > { %v1344_v23 = vsub.f32 %v265_v13, %v272_v19  ;;  %vm279_vm2 = vcmp.ge.f32.partialorder %v1342_v20, 1.0  ;;  %vm281_vm10 = vcmp.le.f32.partialorder %v1342_v20, 14.0 }
  0x65   : > { %949 = vrot.lane.b32.xlu1 %v928_v5, %s1135_s28  ;;  %944 = vrot.lane.b32.xlu0 %v923_v3, %s1135_s28  ;;  %vm1355_vm6 = vmand %vm275_vm1, %vm279_vm2  ;;  %s1060_s28 = scalar_lea.vmem %s1059_s9, 512 }
  0x66   : > { %vm280_vm4 = vcmp.ge.f32.partialorder %v1344_v23, 1.0  ;;  %vm282_vm9 = vcmp.le.f32.partialorder %v1344_v23, 14.0  ;;  %vm803_vm11 = vmpackc.low %vm1355_vm6, %vm1355_vm6  ;;  %vm278_vm6 = vcmp.lt.s32.totalorder %v1338_v11, 240  ;;  %p1062_p13 = scmp.lt.s32.totalorder %s1060_s28, %s1054_s23 }
  0x67   : > { %vm1367_vm8 = vmpackc.low %vm280_vm4, %vm280_vm4 }
  0x68   : > { %vm1409_vm14 = vmpackc.low %vm282_vm9, %vm282_vm9  ;;  %p1063_p3 = por %p1062_p13, %p1061_p10 }
  0x69   : > { %959 = vrot.lane.b32.xlu1 %v928_v5, %s1136_s29  ;;  %954 = vrot.lane.b32.xlu0 %v923_v3, %s1136_s29  ;;  %vm1417_vm15 = vmand %vm275_vm1, %vm281_vm10  ;;  %vm399_vm1 = vcmp.lt.s32.totalorder %v1335_v10, 127 }
  0x6a   : > { %vm812_vm0 = vmpackc.low %vm1417_vm15, %vm1417_vm15  ;;  %p1064_p7 = pnand %p1063_p3, %p1057_p8 }
  0x6d   : > { %969 = vrot.lane.b32.xlu1 %v928_v5, %s1137_s10  ;;  %964 = vrot.lane.b32.xlu0 %v923_v3, %s1137_s10 }
  0x71   : > { %979 = vrot.lane.b32.xlu1 %v928_v5, %s1138_s6  ;;  %974 = vrot.lane.b32.xlu0 %v923_v3, %s1138_s6 }
  0x75   : > { %989 = vrot.lane.b32.xlu1 %v928_v5, %s1139_s5  ;;  %984 = vrot.lane.b32.xlu0 %v923_v3, %s1139_s5 }
  0xcb   : > { %v925_v21 = vpop.permute.xlu1 %924  ;;  %v915_v22 = vpop.permute.xlu0 %914 }
  0xcc   : > { %v926_v24 = vunpack.i.l.bf16 %v925_v21  ;;  %v917_v25 = vunpack.i.h.bf16 %v915_v22  ;;  %v916_v28 = vunpack.i.l.bf16 %v915_v22  ;;  %v927_v33 = vunpack.i.h.bf16 %v925_v21 }
  0xcf   : > { %v930_v26 = vpop.permute.xlu1 %929  ;;  %v920_v27 = vpop.permute.xlu0 %919 }
  0xd0   : > { %v931_v29 = vunpack.i.l.bf16 %v930_v26  ;;  %v922_v30 = vunpack.i.h.bf16 %v920_v27  ;;  %v921_v31 = vunpack.i.l.bf16 %v920_v27  ;;  %v932_v34 = vunpack.i.h.bf16 %v930_v26 }
  0xd2   : > { %v292_v35 = vsel %vm291_vm5, %v916_v28, %v921_v31  ;;  %v293_v36 = vsel %vm291_vm5, %v917_v25, %v922_v30  ;;  %v321_v38 = vsel %vm318_vm3, %v931_v29, %v926_v24  ;;  %v294_v40 = vsel %vm291_vm5, %v921_v31, %v916_v28 }
  0xd3   : > { %v801_v39 = vpack.c.bf16 %v293_v36, %v292_v35  ;;  %v295_v41 = vsel %vm291_vm5, %v922_v30, %v917_v25  ;;  %v940_v42 = vpop.permute.xlu1 %939  ;;  %v935_v43 = vpop.permute.xlu0 %934  ;;  %v322_v48 = vsel %vm318_vm3, %v932_v34, %v927_v33  ;;  %v319_v50 = vsel %vm318_vm3, %v926_v24, %v931_v29 }
  0xd4   : > { %v804_v44 = vpack.c.bf16 %v295_v41, %v294_v40  ;;  %v942_v45 = vunpack.i.h.bf16 %v940_v42  ;;  %v941_v46 = vunpack.i.l.bf16 %v940_v42  ;;  %v937_v47 = vunpack.i.h.bf16 %v935_v43 }
  0xd5   : > { %802 = vmatprep.subr.msk.bf16.mxu0 %vm1367_vm8, %v801_v39  ;;  %v936_v49 = vunpack.i.l.bf16 %v935_v43  ;;  %v320_v51 = vsel %vm318_vm3, %v927_v33, %v932_v34  ;;  %v807_v61 = vpack.c.bf16 %v322_v48, %v321_v38  ;;  %vm1442_vm3 = vmpackc.low %vm279_vm2, %vm279_vm2  ;;  %vm424_vm5 = vcmp.lt.s32.totalorder %v1335_v10, 113 }
  0xd6   : > { %805 = vmatpush1.bf16.msk.msra.mxu0 %vm803_vm11, %v804_v44  ;;  %v345_v52 = vsel %vm343_vm7, %v937_v47, %v942_v45  ;;  %v332_v53 = vpack.c.bf16 %v320_v51, %v319_v50  ;;  %v347_v55 = vsel %vm343_vm7, %v942_v45, %v937_v47  ;;  %vm451_vm2 = vcmp.lt.s32.totalorder %v1335_v10, 112  ;;  %vm833_vm11 = vmpackc.low %vm278_vm6, %vm278_vm6 }
  0xd7   : > { %v344_v56 = vsel %vm343_vm7, %v936_v49, %v941_v46  ;;  %v346_v57 = vsel %vm343_vm7, %v941_v46, %v936_v49  ;;  %v950_v58 = vpop.permute.xlu1 %949  ;;  %v945_v59 = vpop.permute.xlu0 %944  ;;  %vm1470_vm7 = vmand %vm278_vm6, %vm280_vm4 }
  0xd8   : > { %v810_v62 = vpack.c.bf16 %v345_v52, %v344_v56  ;;  %530 = vmatprep.subr.bf16.mxu0 %v332_v53  ;;  %v952_v63 = vunpack.i.h.bf16 %v950_v58  ;;  %v951_v3 = vunpack.i.l.bf16 %v950_v58  ;;  %v947_v8 = vunpack.i.h.bf16 %v945_v59  ;;  %vm1486_vm4 = vmpackc.low %vm281_vm10, %vm281_vm10 }
  0xd9   : > { %v946_v9 = vunpack.i.l.bf16 %v945_v59  ;;  %v813_v12 = vpack.c.bf16 %v347_v55, %v346_v57  ;;  %vm476_vm10 = vcmp.lt.s32.totalorder %v1335_v10, 111 }
  0xda   : > { %808 = vmatpush1.bf16.msk.msra.mxu0 %vm1395_vm12, %v807_v61  ;;  %v372_v13 = vsel %vm370_vm13, %v947_v8, %v952_v63  ;;  %v374_v14 = vsel %vm370_vm13, %v952_v63, %v947_v8  ;;  %vm482_vm12 = vmand %vm278_vm6, %vm282_vm9 }
  0xdb   : > { %v371_v15 = vsel %vm370_vm13, %v946_v9, %v951_v3  ;;  %v373_v16 = vsel %vm370_vm13, %v951_v3, %v946_v9  ;;  %811 = vmatprep.subr.msk.bf16.mxu0 %vm1409_vm14, %v810_v62  ;;  %v960_v17 = vpop.permute.xlu1 %959  ;;  %v955_v18 = vpop.permute.xlu0 %954  ;;  %vm836_vm13 = vmpackc.low %vm482_vm12, %vm482_vm12  ;;  %v993_v3 = vld [vmem:[#allocation6] ss:$8 sps:$4 sm:$0xff]  }
  0xdc   : > { %v816_v19 = vpack.c.bf16 %v372_v13, %v371_v15  ;;  %v962_v21 = vunpack.i.h.bf16 %v960_v17  ;;  %v961_v22 = vunpack.i.l.bf16 %v960_v17  ;;  %v957_v24 = vunpack.i.h.bf16 %v955_v18 }
  0xdd   : > { %v956_v25 = vunpack.i.l.bf16 %v955_v18  ;;  %v819_v26 = vpack.c.bf16 %v374_v14, %v373_v16 }
  0xde   : > { %814 = vmatpush1.bf16.msk.msra.mxu0 %vm812_vm0, %v813_v12  ;;  %v403_v30 = vsel %vm399_vm1, %v962_v21, %v957_v24  ;;  %v401_v36 = vsel %vm399_vm1, %v957_v24, %v962_v21 }
  0xdf   : > { %817 = vmatprep.subr.msk.bf16.mxu0 %vm1367_vm8, %v816_v19  ;;  %v970_v28 = vpop.permute.xlu1 %969  ;;  %v965_v29 = vpop.permute.xlu0 %964  ;;  %v402_v31 = vsel %vm399_vm1, %v961_v22, %v956_v25  ;;  %v400_v37 = vsel %vm399_vm1, %v956_v25, %v961_v22  ;;  %vm827_vm8 = vmpackc.low %vm1470_vm7, %vm1470_vm7 }
  0xe0   : > { %v972_v32 = vunpack.i.h.bf16 %v970_v28  ;;  %v971_v33 = vunpack.i.l.bf16 %v970_v28  ;;  %v967_v34 = vunpack.i.h.bf16 %v965_v29  ;;  %v966_v35 = vunpack.i.l.bf16 %v965_v29 }
  0xe1   : > { %v822_v38 = vpack.c.bf16 %v403_v30, %v402_v31 }
  0xe2   : > { %820 = vmatpush1.bf16.msk.msra.mxu0 %vm1442_vm3, %v819_v26  ;;  %v428_v41 = vsel %vm424_vm5, %v972_v32, %v967_v34  ;;  %v427_v42 = vsel %vm424_vm5, %v971_v33, %v966_v35  ;;  %v426_v46 = vsel %vm424_vm5, %v967_v34, %v972_v32  ;;  %v425_v47 = vsel %vm424_vm5, %v966_v35, %v971_v33 }
  0xe3   : > { %536 = vmatprep.subr.bf16.mxu0 %v388_v6  ;;  %v980_v39 = vpop.permute.xlu1 %979  ;;  %v975_v40 = vpop.permute.xlu0 %974  ;;  %v825_v6 = vpack.c.bf16 %v401_v36, %v400_v37  ;;  %v828_v48 = vpack.c.bf16 %v428_v41, %v427_v42  ;;  %v831_v54 = vpack.c.bf16 %v426_v46, %v425_v47 }
  0xe4   : > { %v982_v43 = vunpack.i.h.bf16 %v980_v39  ;;  %v981_v44 = vunpack.i.l.bf16 %v980_v39  ;;  %v977_v2 = vunpack.i.h.bf16 %v975_v40  ;;  %v976_v4 = vunpack.i.l.bf16 %v975_v40 }
  0xe6   : > { %537 = vmatpush1.bf16.msra.mxu0 %v387_v7  ;;  %v455_v0 = vsel %vm451_vm2, %v982_v43, %v977_v2  ;;  %v454_v50 = vsel %vm451_vm2, %v981_v44, %v976_v4  ;;  %v452_v56 = vsel %vm451_vm2, %v976_v4, %v981_v44  ;;  %v453_v57 = vsel %vm451_vm2, %v977_v2, %v982_v43 }
  0xe7   : > { %823 = vmatprep.subr.msk.bf16.mxu0 %vm1409_vm14, %v822_v38  ;;  %v990_v1 = vpop.permute.xlu1 %989  ;;  %v985_v7 = vpop.permute.xlu0 %984  ;;  %v834_v55 = vpack.c.bf16 %v455_v0, %v454_v50  ;;  %v464_v60 = vpack.c.bf16 %v453_v57, %v452_v56 }
  0xe8   : > { %v992_v51 = vunpack.i.h.bf16 %v990_v1  ;;  %v991_v52 = vunpack.i.l.bf16 %v990_v1  ;;  %v987_v20 = vunpack.i.h.bf16 %v985_v7  ;;  %v986_v53 = vunpack.i.l.bf16 %v985_v7 }
  0xea   : > { %826 = vmatpush1.bf16.msk.msra.mxu0 %vm1486_vm4, %v825_v6  ;;  %v480_v58 = vsel %vm476_vm10, %v992_v51, %v987_v20  ;;  %v479_v59 = vsel %vm476_vm10, %v991_v52, %v986_v53  ;;  %v478_v61 = vsel %vm476_vm10, %v987_v20, %v992_v51  ;;  %v477_v62 = vsel %vm476_vm10, %v986_v53, %v991_v52 }
  0xeb   : > { %829 = vmatprep.subr.msk.bf16.mxu0 %vm827_vm8, %v828_v48  ;;  %v837_v10 = vpack.c.bf16 %v480_v58, %v479_v59  ;;  %v840_v63 = vpack.c.bf16 %v478_v61, %v477_v62 }
  0xee   : > { %832 = vmatpush1.bf16.msk.msra.mxu0 %vm1442_vm3, %v831_v54 }
  0xef   : > { %835 = vmatprep.subr.msk.bf16.mxu0 %vm833_vm11, %v834_v55 }
  0xf2   : > { %543 = vmatpush1.bf16.msra.mxu0 %v464_v60 }
  0xf3   : > { %838 = vmatprep.subr.msk.bf16.mxu0 %vm836_vm13, %v837_v10 }
  0xf6   : > { %841 = vmatpush1.bf16.msk.msra.mxu0 %vm1486_vm4, %v840_v63 }
  0xf9   : > { %561 = vmatmul.mubr.bf16.vlgmr.msra.gmra.mrb[0].mxu0 %v993_v3 }
 0x1cc   : > { %v562_v11 = vpop.f32.mrb[0].mxu0 }
 0x1cd   : > { %v564_v23 = vpop.f32.mrb[1].mxu0  ;;  %v577_v5 = vmul.f32 %v562_v11, %v562_v11 }
 0x1ce   : > { %v797_v8 = vpack.c.bf16 %v564_v23, %v562_v11  ;;  %v566_v9 = vpop.f32.mrb[2].mxu0  ;;  %v571_v12 = vadd.f32 %v564_v23, %v562_v11  ;;  %v578_v13 = vmul.f32 %v564_v23, %v564_v23 }
 0x1cf   : > { %v568_v14 = vpop.f32.mrb[3].mxu0  ;;  %v579_v15 = vmul.f32 %v566_v9, %v566_v9 }
 0x1d0   : > { %599 = vst [vmem:[%s231_s26] sm:$0xff] %v797_v8  ;;  %v580_v16 = vmul.f32 %v568_v14, %v568_v14  ;;  %v798_v17 = vpack.c.bf16 %v568_v14, %v566_v9  ;;  %572 = vadd.xlane.f32.xlu0 %v571_v12  ;;  %v574_v18 = vadd.f32 %v568_v14, %v566_v9 }
 0x1d1   : > { %v581_v19 = vadd.f32 %v578_v13, %v577_v5 }
 0x1d2   : > { %600 = vst [vmem:[%s231_s26 + $0x8] sm:$0xff] %v798_v17  ;;  %575 = vadd.xlane.f32.xlu1 %v574_v18  ;;  %v584_v21 = vadd.f32 %v580_v16, %v579_v15 }
 0x1d4   : > { %582 = vadd.xlane.f32.xlu0 %v581_v19 }
 0x1d8   : > { %585 = vadd.xlane.f32.xlu0 %v584_v21 }
 0x1d9   : > { %1067 = shalt.err (!%p1064_p7)
}
 0x1da   : > { %s1068_s29 = scalar_lea.hbm %s1522_s14, 256  ;;  %s1072_s5 = scalar_lea.hbm %s1576_s2, 512 }
 0x1db   : > { %p1069_p9 = scmp.ne.s32.totalorder %s1522_s14, %s1068_s29  ;;  %p1073_p5 = scmp.lt.u32.totalorder %s1522_s14, %s1576_s2 }
 0x1dc   : > { %p1074_p1 = scmp.lt.u32.totalorder %s1072_s5, %s1068_s29  ;;  %p1076_p4 = scmp.lt.u32.totalorder %s1068_s29, %s1522_s14 }
 0x1dd   : > { %p1070_p2 = pnand %p1069_p9, %p1259_p12 }
 0x1de   : > { %p1075_p11 = por %p1074_p1, %p1073_p5 }
 0x1df   : > { %p1071_p0 = pneg %p1070_p2 }
 0x1e0   : > { %p1077_p6 = por %p1076_p4, %p1075_p11 }
 0x1e2   : > { %p1078_p8 = pnand %p1077_p6, %p1071_p0 }
 0x1e4   : > { %1081 = shalt.err (!%p1078_p8)
}
 0x1e5   : > { %s1141_s25 = smov 128   ;;  %s1142_s11 = smov 8   ;;  %vm601_vm9 = vcmask 7168  }
 0x1e6   : > { %848 = dma.vmem_to_hbm [thread:$0]  (%p1259_p12), %s1516_s8, 256, %s1522_s14, %s607_s20, %s1141_s25, %s1141_s25, %s1142_s11  }
 0x1e7   : > { %p246_p10 = scmp.lt.s32.totalorder %s1189_s19, 1 }
 0x1e9   : > { %s1616_s19 = smov (!%p246_p10, %s1189_s19), 1 }
 0x1ea   : > { %s795_s13 = sshll.u32 %s1616_s19, 4 }
 0x1eb   : > { %s250_s9 = scalar_lea.vmem %s1577_s3, %s795_s13  ;;  %s255_s10 = scalar_lea.vmem %s1578_s4, %s795_s13 }
 0x25d   : > { %v573_v22 = vpop.xlane.xlu0 %572 }
 0x25e   : > { %602 = vst.msk [vmem:[%s250_s9] sm:$0xff] %vm601_vm9, %v573_v22 }
 0x25f   : > { %v576_v24 = vpop.xlane.xlu1 %575 }
 0x260   : > { %603 = vst.msk [vmem:[%s250_s9 + $0x8] sm:$0xff] %vm601_vm9, %v576_v24 }
 0x261   : > { %v583_v25 = vpop.xlane.xlu0 %582 }
 0x262   : > { %604 = vst.msk [vmem:[%s255_s10] sm:$0xff] %vm601_vm9, %v583_v25 }
 0x265   : > { %v586_v26 = vpop.xlane.xlu0 %585 }
 0x266   : > { %605 = vst.msk [vmem:[%s255_s10 + $0x8] sm:$0xff] %vm601_vm9, %v586_v26 }
 0x267 PF: > { %s651_s19 = sand.u32 1, %s1112_s15   ;;  %p1609_p12 = scmp.ne.s32.totalorder %s1583_s22, 0 }
 0x268   : > { %p1610_p13 = scmp.ge.s32.totalorder %s1124_s18, 2  ;;  %s652_s30 = scalar_lea.sflag [#allocation5], %s651_s19 }
 0x26a   : > { %p859_p3 = pnand %p1610_p13, %p1609_p12 }
 0x26c   : > { %1107 = dma.done.wait (!%p859_p3), %s652_s30, 256  }
 0x26d   : > { %1109 = vsyncadd (!%p859_p3), %s652_s30, 4294967040  ;;  %p19_p7 = scmp.ge.s32.totalorder %s1224_s27, 4   ;;  %s1611_s15 = smov %s1116_s16 }
 0x26e   : > { %s1612_s16 = smov %s1120_s17  ;;  %s1613_s17 = smov %s1255_s24 }
 0x26f   : > { %s1614_s18 = smov %s1224_s27  ;;  %21 = sbr.rel (!%p19_p7) target bundleno = 6 (0x6), region = 101 }
 0x276   :  { %673 = vsyncpa [#allocation4], 1 }
 0x277   :  { %675 = vsyncpa [#allocation4 + $0x1], 1 }
 0x278   :  { %676 = vsyncpa [#allocation7], 1 }
 0x279   :  { %677 = vsyncpa [#allocation5], 1 }
 0x27a   :  { %679 = vsyncpa [#allocation5 + $0x1], 1 }

</bundles_post_ra>
